<compile_context>
chip_gen: v7x
topology: tpu7x:2x2x1
jax: 0.10.0
libtpu: 0.0.40
codegen_flags: <defaults>
</compile_context>

<pallas_src>
import jax
import jax.numpy as jnp
from jax.experimental import pallas as pl
from jax.experimental.pallas import tpu as pltpu


# --------------------------------------------------------------------------- #
# Kernels
# --------------------------------------------------------------------------- #
def _attention_single_block_kernel(e_ref, w_ref, ws_ref, sc_ref):
    """Whole sequence resident in one block: plain (stable) softmax."""
    e = e_ref[...]                                              # (tb, S, D)
    w = w_ref[...]                                              # (1, D) lane-major

    # Raw scores with f32 accumulation over the embedding (lane) axis.
    raw = jnp.sum(e * w[None, :, :], axis=-1, dtype=jnp.float32)   # (tb, S)

    m = jnp.max(raw, axis=-1, keepdims=True)                    # (tb, 1)
    p = jnp.exp(raw - m)                                        # (tb, S)
    inv_l = pl.reciprocal(jnp.sum(p, axis=-1, keepdims=True), approx=False)
    p = p * inv_l                                               # (tb, S)

    # Weighted sum over the sequence axis on the VPU, f32 accumulation
    # (avoids the worst-case M=1 MXU shape and the (tb,1,S) relayout of p).
    ws = jnp.sum(e * p.astype(e.dtype)[:, :, None], axis=1, dtype=jnp.float32)

    ws_ref[...] = ws.astype(ws_ref.dtype)                       # (tb, D)
    sc_ref[...] = p.astype(sc_ref.dtype)                        # (tb, S) lane-dense


def _make_online_kernel(ns, ts, S, tb, mask_tail):
    """Sequence-split path: online softmax over an 'arbitrary' seq grid axis."""

    def kernel(e_ref, w_ref, ws_ref, raw_ref, m_ref, l_ref, m_sc, l_sc, acc_sc):
        s_idx = pl.program_id(1)

        @pl.when(s_idx == 0)
        def _init():
            m_sc[...] = jnp.full_like(m_sc, -jnp.inf)
            l_sc[...] = jnp.zeros_like(l_sc)
            acc_sc[...] = jnp.zeros_like(acc_sc)

        e = e_ref[...]                                          # (tb, ts, D)
        w = w_ref[...]                                          # (1, D)

        if mask_tail:
            # Padded seq positions past S: zero the embeddings (so OOB garbage,
            # possibly NaN, never reaches the accumulators) and -inf the scores.
            col = s_idx * ts + jax.lax.broadcasted_iota(jnp.int32, (tb, ts), 1)
            valid = col < S
            e = jnp.where(valid[:, :, None], e, jnp.zeros_like(e))

        raw = jnp.sum(e * w[None, :, :], axis=-1, dtype=jnp.float32)   # (tb, ts)
        if mask_tail:
            raw = jnp.where(valid, raw, -jnp.inf)

        m_prev = m_sc[...]                                      # (tb, 1)
        m_new = jnp.maximum(m_prev, jnp.max(raw, axis=-1, keepdims=True))
        alpha = jnp.exp(m_prev - m_new)                         # (tb, 1)
        p = jnp.exp(raw - m_new)                                # (tb, ts)

        l_sc[...] = alpha * l_sc[...] + jnp.sum(p, axis=-1, keepdims=True)
        acc_sc[...] = alpha * acc_sc[...] + jnp.sum(
            e * p.astype(e.dtype)[:, :, None], axis=1, dtype=jnp.float32)
        m_sc[...] = m_new

        # Raw (pre-softmax) scores go out per seq block, lane-dense f32.
        raw_ref[...] = raw

        @pl.when(s_idx == ns - 1)
        def _finalize():
            inv_l = pl.reciprocal(l_sc[...], approx=False)
            ws_ref[...] = (acc_sc[...] * inv_l).astype(ws_ref.dtype)
            m_ref[...] = m_sc[...]
            l_ref[...] = l_sc[...]

    return kernel


def _normalize_scores_kernel(raw_ref, m_ref, l_ref, sc_ref):
    """Tiny epilogue: scores = exp(raw - m) / l, reads only (B, S)-sized data."""
    inv_l = pl.reciprocal(l_ref[...], approx=False)             # (tb, 1)
    sc_ref[...] = (jnp.exp(raw_ref[...] - m_ref[...]) * inv_l).astype(sc_ref.dtype)


# --------------------------------------------------------------------------- #
# Planning helpers (padded-footprint, generation-aware tiling)
# --------------------------------------------------------------------------- #
def _tpu_topology():
    """Best-effort (n_tensorcores, physical VMEM bytes) with safe fallbacks."""
    n_cores, vmem = 1, 64 << 20  # conservative default = v7x per-TC VMEM
    try:
        info = pltpu.get_tpu_info()
    except Exception:
        info = None
    if info is not None:
        for attr in ("num_cores", "core_count", "num_tensorcores",
                     "tensorcore_count", "cores_per_chip", "num_cores_per_chip"):
            v = getattr(info, attr, None)
            if v is None:
                continue
            try:
                v = int(v)
            except Exception:
                continue
            if v > 0:
                n_cores = v
                break
        v = getattr(info, "vmem_capacity_bytes", None)
        if v is not None:
            try:
                v = int(v)
                if v > 0:
                    vmem = v
            except Exception:
                pass
    return n_cores, vmem


def _choose_tb(B, cap_rows, sub, n_cores):
    """Batch-tile rows: full extent, or a multiple of the sublane granularity
    (so (tb, D)/(tb, S) output blocks stay (8,128)-tileable), under cap_rows."""
    if B <= sub:
        return B                        # can't split with aligned tiles
    cap_rows = max(sub, min(cap_rows, B))
    if n_cores <= 1:
        # Single TensorCore: the grid is a sequential loop -> one big block.
        return B if cap_rows >= B else (cap_rows // sub) * sub

    # Multiple TensorCores share the 'parallel' batch axis: prefer step counts
    # that are a multiple of n_cores (no idle core), then >=2 steps per core,
    # then minimal ragged-padding waste, then the largest tile.
    cands = list(range(sub, (min(cap_rows, B - 1) // sub) * sub + 1, sub))
    if cap_rows >= B:
        cands.append(B)
    best_key, best_tb = None, cands[0]
    for t in cands:
        steps = -(-B // t)
        key = (steps % n_cores == 0 and steps >= n_cores,
               min(steps, 2 * n_cores),
               -(steps * t - B),
               t)
        if best_key is None or key > best_key:
            best_key, best_tb = key, t
    return best_tb


def _attention_plan(B, S, D, dtype, tile_cap_bytes=None):
    itemsize = jnp.dtype(dtype).itemsize
    sub = {4: 8, 2: 16, 1: 32}.get(itemsize, 8)     # sublane granularity
    lanes = pl.cdiv(D, 128) * 128                   # lane-padded embedding dim
    n_cores, vmem_phys = _tpu_topology()

    if tile_cap_bytes is None:
        # Per-buffer input tile target: big enough to approach the HBM roofline,
        # small enough that the double-buffered pair leaves VMEM headroom.
        tile_cap_bytes = min(16 << 20, vmem_phys // 4)

    s_pad_full = pl.cdiv(S, sub) * sub
    row_bytes = s_pad_full * lanes * itemsize       # one padded batch row, full S
    tb_min = B if B < sub else sub                  # smallest aligned batch tile

    ts = S
    if tb_min * row_bytes > tile_cap_bytes:
        # Sequence split. ts is a multiple of 128 so the per-step raw-score
        # output blocks (tb, ts) stay lane-tileable.
        budget = tile_cap_bytes // (tb_min * lanes * itemsize)
        ts = max(128, (budget // 128) * 128)
    ns = pl.cdiv(S, ts)
    if ns == 1:
        ts = S
    s_out = ns * ts

    if ns == 1:
        cap_rows = max(tb_min, tile_cap_bytes // row_bytes)
        tb = _choose_tb(B, cap_rows, sub, n_cores)
    else:
        tb = tb_min
    nb = pl.cdiv(B, tb)

    # Normalization-epilogue tiling (split mode only): keep f32 blocks small.
    ts2 = s_out
    max_elems = max(128, (4 << 20) // (max(tb, 1) * 4))
    if ts2 > max_elems:
        ts2 = max(128, (max_elems // 128) * 128)
    ns2 = pl.cdiv(s_out, ts2)

    # Padded-footprint VMEM estimate -> explicit vmem_limit_bytes.
    tb_pad = pl.cdiv(tb, 8) * 8
    ts_pad = pl.cdiv(ts, sub) * sub
    in_tile = tb * ts_pad * lanes * itemsize
    ws_blk = tb_pad * lanes * itemsize
    if ns == 1:
        sc_blk = tb_pad * pl.cdiv(S, 128) * 128 * itemsize
        stat_blk = 0
    else:
        sc_blk = tb_pad * pl.cdiv(ts, 128) * 128 * 4
        stat_blk = 2 * tb_pad * 128 * 4
    scratch = tb_pad * lanes * 4 + 2 * tb_pad * 128 * 4
    needed = 2 * (in_tile + ws_blk + sc_blk + stat_blk) + scratch + (8 << 20)
    vmem_limit = int(min(vmem_phys * 3 // 4, max(needed, 32 << 20)))

    return dict(tb=tb, ts=ts, ns=ns, s_out=s_out, nb=nb,
                ts2=ts2, ns2=ns2, vmem_limit=vmem_limit)


# --------------------------------------------------------------------------- #
# Wrapper
# --------------------------------------------------------------------------- #
def attention_layer(embeddings, attention_weights, *, tile_cap_bytes=None):
    """embeddings: (B, S, D), attention_weights: (D, 1)
       -> (weighted_sum (B, D), scores (B, S))"""
    B, S, D = embeddings.shape
    dtype = embeddings.dtype
    w_row = attention_weights.reshape(1, D).astype(dtype)       # lane-major weight

    plan = _attention_plan(B, S, D, dtype, tile_cap_bytes)
    tb, ts, ns, s_out, nb = plan["tb"], plan["ts"], plan["ns"], plan["s_out"], plan["nb"]

    if ns == 1:
        # Whole sequence fits one block per batch tile.
        ws, sc = pl.pallas_call(
            _attention_single_block_kernel,
            out_shape=(
                jax.ShapeDtypeStruct((B, D), dtype),
                jax.ShapeDtypeStruct((B, S), dtype),
            ),
            grid_spec=pltpu.PrefetchScalarGridSpec(
                num_scalar_prefetch=0,
                grid=(nb,),
                in_specs=[
                    pl.BlockSpec((tb, S, D), lambda b: (b, 0, 0)),
                    pl.BlockSpec((1, D), lambda b: (0, 0)),
                ],
                out_specs=[
                    pl.BlockSpec((tb, D), lambda b: (b, 0)),
                    pl.BlockSpec((tb, S), lambda b: (b, 0)),
                ],
            ),
            compiler_params=pltpu.CompilerParams(
                dimension_semantics=("parallel",),
                vmem_limit_bytes=plan["vmem_limit"],
            ),
        )(embeddings, w_row)
        return ws, sc

    # ---- sequence-split path: online softmax over an 'arbitrary' seq axis ----
    kernel = _make_online_kernel(ns=ns, ts=ts, S=S, tb=tb, mask_tail=(s_out != S))
    ws, raw, m, l = pl.pallas_call(
        kernel,
        out_shape=(
            jax.ShapeDtypeStruct((B, D), dtype),
            jax.ShapeDtypeStruct((B, s_out), jnp.float32),
            jax.ShapeDtypeStruct((B, 1), jnp.float32),
            jax.ShapeDtypeStruct((B, 1), jnp.float32),
        ),
        grid_spec=pltpu.PrefetchScalarGridSpec(
            num_scalar_prefetch=0,
            grid=(nb, ns),
            in_specs=[
                pl.BlockSpec((tb, ts, D), lambda b, s: (b, s, 0)),
                pl.BlockSpec((1, D), lambda b, s: (0, 0)),
            ],
            out_specs=[
                pl.BlockSpec((tb, D), lambda b, s: (b, 0)),
                pl.BlockSpec((tb, ts), lambda b, s: (b, s)),
                pl.BlockSpec((tb, 1), lambda b, s: (b, 0)),
                pl.BlockSpec((tb, 1), lambda b, s: (b, 0)),
            ],
            scratch_shapes=[
                pltpu.VMEM((tb, 1), jnp.float32),   # running max
                pltpu.VMEM((tb, 1), jnp.float32),   # running denom
                pltpu.VMEM((tb, D), jnp.float32),   # weighted-sum accumulator
            ],
        ),
        compiler_params=pltpu.CompilerParams(
            dimension_semantics=("parallel", "arbitrary"),
            vmem_limit_bytes=plan["vmem_limit"],
        ),
    )(embeddings, w_row)

    # Normalization epilogue over the (B, s_out) raw scores (D-times smaller
    # than the embedding stream).
    ts2, ns2 = plan["ts2"], plan["ns2"]
    sc = pl.pallas_call(
        _normalize_scores_kernel,
        out_shape=jax.ShapeDtypeStruct((B, s_out), dtype),
        grid_spec=pltpu.PrefetchScalarGridSpec(
            num_scalar_prefetch=0,
            grid=(nb, ns2),
            in_specs=[
                pl.BlockSpec((tb, ts2), lambda b, s: (b, s)),
                pl.BlockSpec((tb, 1), lambda b, s: (b, 0)),
                pl.BlockSpec((tb, 1), lambda b, s: (b, 0)),
            ],
            out_specs=pl.BlockSpec((tb, ts2), lambda b, s: (b, s)),
        ),
        compiler_params=pltpu.CompilerParams(
            dimension_semantics=("parallel", "arbitrary"),
            vmem_limit_bytes=plan["vmem_limit"],
        ),
    )(raw, m, l)

    if s_out != S:
        sc = sc[:, :S]
    return ws, sc


def attention_layer_ref(embeddings, attention_weights):
    scores = jnp.matmul(embeddings, attention_weights)          # (B, S, 1)
    scores = jax.nn.softmax(scores, axis=1)
    weighted_sum = jnp.sum(embeddings * scores, axis=1)         # (B, D)
    return weighted_sum, scores[..., 0]


if __name__ == "__main__":
    key = jax.random.PRNGKey(0)
    k_emb, k_w, k_emb2, k_w2 = jax.random.split(key, 4)

    # Small demo shape consistent with the module: batch=2, seq=8, embedding_dim=32.
    B, S, D = 2, 8, 32
    embeddings = jax.random.normal(k_emb, (B, S, D), dtype=jnp.float32)
    attention_weights = jax.random.normal(k_w, (D, 1), dtype=jnp.float32)

    ws, sc = attention_layer(embeddings, attention_weights)
    jax.block_until_ready((ws, sc))
    ws_ref, sc_ref = attention_layer_ref(embeddings, attention_weights)
    assert ws.shape == (B, D) and sc.shape == (B, S)
    assert jnp.allclose(ws, ws_ref, atol=1e-5, rtol=1e-5)
    assert jnp.allclose(sc, sc_ref, atol=1e-5, rtol=1e-5)

    # Exercise the sequence-split (online-softmax) path plus ragged batch/seq
    # tiles by forcing a small per-buffer tile cap.
    B2, S2, D2 = 12, 300, 40
    emb2 = jax.random.normal(k_emb2, (B2, S2, D2), dtype=jnp.float32)
    w2 = jax.random.normal(k_w2, (D2, 1), dtype=jnp.float32)
    ws2, sc2 = attention_layer(emb2, w2, tile_cap_bytes=512 * 1024)
    jax.block_until_ready((ws2, sc2))
    ws2_ref, sc2_ref = attention_layer_ref(emb2, w2)
    assert ws2.shape == (B2, D2) and sc2.shape == (B2, S2)
    assert jnp.allclose(ws2, ws2_ref, atol=1e-4, rtol=1e-4)
    assert jnp.allclose(sc2, sc2_ref, atol=1e-4, rtol=1e-4)

    print("KERNEL_OK")
</pallas_src>

<mosaic_0001>
module attributes {stable_mosaic.version = 11 : i64} {
  func.func @_attention_single_block_kernel(%arg0: i32, %arg1: memref<2x8x32xf32, #tpu.memory_space<vmem>>, %arg2: memref<1x32xf32, #tpu.memory_space<vmem>>, %arg3: memref<2x32xf32, #tpu.memory_space<vmem>>, %arg4: memref<2x8xf32, #tpu.memory_space<vmem>>) attributes {dimension_semantics = [#tpu.dimension_semantics<parallel>], iteration_bounds = array<i64: 1>, scalar_prefetch = 0 : i64, scratch_operands = 0 : i64, tpu.core_type = #tpu.core_type<tc>, window_params = [{transform_indices = @transform_0, window_bounds = array<i64: 2, 8, 32>}, {pipeline_mode = #tpu.pipeline_mode<synchronous>, transform_indices = @transform_1, window_bounds = array<i64: 1, 32>}, {transform_indices = @transform_2, window_bounds = array<i64: 2, 32>}, {transform_indices = @transform_3, window_bounds = array<i64: 2, 8>}]} {
    %c0 = arith.constant 0 : index
    %c0_0 = arith.constant 0 : index
    %c0_1 = arith.constant 0 : index
    %0 = vector.load %arg1[%c0, %c0_0, %c0_1] : memref<2x8x32xf32, #tpu.memory_space<vmem>>, vector<2x8x32xf32>
    %c0_2 = arith.constant 0 : index
    %c0_3 = arith.constant 0 : index
    %1 = vector.load %arg2[%c0_2, %c0_3] : memref<1x32xf32, #tpu.memory_space<vmem>>, vector<1x32xf32>
    %2 = vector.shape_cast %1 : vector<1x32xf32> to vector<1x1x32xf32>
    %3 = vector.broadcast %2 : vector<1x1x32xf32> to vector<2x8x32xf32>
    %4 = arith.mulf %0, %3 : vector<2x8x32xf32>
    %cst = arith.constant dense<0.000000e+00> : vector<2x8xf32>
    %5 = vector.multi_reduction <add>, %4, %cst [2] : vector<2x8x32xf32> to vector<2x8xf32>
    %cst_4 = arith.constant dense<0xFF800000> : vector<2xf32>
    %6 = vector.multi_reduction <maximumf>, %5, %cst_4 [1] : vector<2x8xf32> to vector<2xf32>
    %7 = vector.shape_cast %6 : vector<2xf32> to vector<2x1xf32>
    %8 = vector.broadcast %7 : vector<2x1xf32> to vector<2x8xf32>
    %9 = arith.subf %5, %8 : vector<2x8xf32>
    %10 = math.exp %9 : vector<2x8xf32>
    %cst_5 = arith.constant dense<0.000000e+00> : vector<2xf32>
    %11 = vector.multi_reduction <add>, %10, %cst_5 [1] : vector<2x8xf32> to vector<2xf32>
    %12 = vector.shape_cast %11 : vector<2xf32> to vector<2x1xf32>
    %13 = tpu.reciprocal %12 : vector<2x1xf32> -> vector<2x1xf32>
    %14 = vector.broadcast %13 : vector<2x1xf32> to vector<2x8xf32>
    %15 = arith.mulf %10, %14 : vector<2x8xf32>
    %16 = vector.shape_cast %15 : vector<2x8xf32> to vector<2x8x1xf32>
    %17 = vector.broadcast %16 : vector<2x8x1xf32> to vector<2x8x32xf32>
    %18 = arith.mulf %0, %17 : vector<2x8x32xf32>
    %cst_6 = arith.constant dense<0.000000e+00> : vector<2x32xf32>
    %19 = vector.multi_reduction <add>, %18, %cst_6 [1] : vector<2x8x32xf32> to vector<2x32xf32>
    %c0_7 = arith.constant 0 : index
    %c0_8 = arith.constant 0 : index
    %20 = vector.load %arg3[%c0_7, %c0_8] : memref<2x32xf32, #tpu.memory_space<vmem>>, vector<2x32xf32>
    tpu.vector_store %arg3[%c0_7, %c0_8], %19 {strides = array<i32>} : memref<2x32xf32, #tpu.memory_space<vmem>>, vector<2x32xf32>,
    %c0_9 = arith.constant 0 : index
    %c0_10 = arith.constant 0 : index
    %21 = vector.load %arg4[%c0_9, %c0_10] : memref<2x8xf32, #tpu.memory_space<vmem>>, vector<2x8xf32>
    tpu.vector_store %arg4[%c0_9, %c0_10], %15 {strides = array<i32>} : memref<2x8xf32, #tpu.memory_space<vmem>>, vector<2x8xf32>,
    return
  }
  func.func @transform_0(%arg0: i32) -> (i32, i32, i32) {
    %c0_i32 = arith.constant 0 : i32
    %c0_i32_0 = arith.constant 0 : i32
    %c0_i32_1 = arith.constant 0 : i32
    return %arg0, %c0_i32, %c0_i32_0 : i32, i32, i32
  }
  func.func @transform_1(%arg0: i32) -> (i32, i32) {
    %c0_i32 = arith.constant 0 : i32
    %c0_i32_0 = arith.constant 0 : i32
    %c0_i32_1 = arith.constant 0 : i32
    return %c0_i32, %c0_i32_0 : i32, i32
  }
  func.func @transform_2(%arg0: i32) -> (i32, i32) {
    %c0_i32 = arith.constant 0 : i32
    %c0_i32_0 = arith.constant 0 : i32
    return %arg0, %c0_i32 : i32, i32
  }
  func.func @transform_3(%arg0: i32) -> (i32, i32) {
    %c0_i32 = arith.constant 0 : i32
    %c0_i32_0 = arith.constant 0 : i32
    return %arg0, %c0_i32 : i32, i32
  }
}

</mosaic_0001>

<bundles_post_ra>
// kernel: tpu_custom_call.1
= control target key start
LH: loop header
LB: loop body
LE: loop exit
PB: predicated region body
PF: predicated region fallthrough
CT: control target
= control target key end

     0   :  { %9 = vsyncpa [#allocation3], 0  ;;  %s353_s0 = inlined_call_operand.hbm [shape: f32[2,8,32], index: 0, kind: input, shape index: {}]   ;;  %s354_s1 = inlined_call_operand.vmem [shape: f32[1,32], index: 1, kind: input, shape index: {}]   ;;  %s355_s2 = inlined_call_operand.hbm [shape: f32[2,32], index: 2, kind: output, shape index: {0}]   ;;  %s356_s3 = inlined_call_operand.hbm [shape: f32[2,8], index: 3, kind: output, shape index: {1}]  }
   0x1   :  { %10 = vsyncpa [#allocation4], 0 }
   0x2   :  { %11 = vsyncpa [#allocation7], 0  ;;  %s277_s12 = smov [#allocation2]   ;;  %s205_s16 = scalar_lea.hbm %s353_s0, 256 }
   0x3   :  { %s17_s13 = sshll.u32 %s277_s12, 4  ;;  %p206_p0 = scmp.ne.s32.totalorder %s353_s0, %s205_s16  ;;  %s18_s13 = int_to_ptr.vmem [resolvable:$true] %s17_s13 }
   0x4   :  { %p209_p1 = scmp.lt.u32.totalorder %s205_s16, %s353_s0 }
   0x6   :  { %p211_p2 = pnand %p209_p1, %p206_p0 }
   0x8   :  { %214 = shalt.err (!%p211_p2)
}
   0x9   :  { %s215_s21 = scalar_lea.vmem %s18_s13, 256  ;;  %p220_p4 = scmp.lt.s32.totalorder %s18_s13, %s18_s13 }
   0xa   :  { %p216_p3 = scmp.ne.s32.totalorder %s18_s13, %s215_s21  ;;  %p221_p5 = scmp.lt.s32.totalorder %s215_s21, %s215_s21 }
   0xc   :  { %p222_p6 = por %p221_p5, %p220_p4 }
   0xe   :  { %p223_p7 = pnand %p222_p6, %p216_p3 }
  0x10   :  { %226 = shalt.err (!%p223_p7)
}
  0x11   :  { %s278_s22 = smov 128   ;;  %s279_s23 = smov 8  }
  0x12   :  { %23 = dma.hbm_to_vmem [thread:$0]  %s353_s0, 256, %s18_s13, [#allocation3], %s278_s22, %s278_s22, %s279_s23  }
  0x13   :  { %271 = dma.done.wait [#allocation3], 256  }
  0x14   :  { %272 = vsyncadd [#allocation3], 4294967040  ;;  %v29_v0 = vld [vmem:[#allocation2] sm:$0xff]  ;;  %vm40_vm0 = vcmask 261120   ;;  %v30_v2 = vld [vmem:[#allocation2 + $0x8] sm:$0xff]  ;;  %v49_v7 = vlaneseq  ;;  %vm59_vm1 = vcmask 1041409  }
  0x15   :  { %v190_v1 = vld [vmem:[%s354_s1] ss:$0 sm:$0xff]  ;;  %vm62_vm2 = vcmask 58368   ;;  %v280_v17 = vmov 0   ;;  %s281_s0 = smov [#allocation6]  }
  0x16   :  { %v38_v3 = vmul.f32 %v190_v1, %v29_v0  ;;  %v39_v4 = vmul.f32 %v190_v1, %v30_v2  ;;  %v50_v8 = vand.u32 127, %v49_v7  ;;  %v52_v9 = vshrl.u32 %v49_v7, 7  ;;  %198 = vset.pattern.permute.xlu0 %v280_v17  ;;  %197 = vset.pattern.permute.xlu1 %v280_v17  ;;  %s177_s1 = sshll.u32 %s281_s0, 4  ;;  %s178_s1 = int_to_ptr.vmem [resolvable:$true] %s177_s1 }
  0x17   :  { %s227_s28 = scalar_lea.vmem %s178_s1, 32  ;;  %p232_p9 = scmp.lt.s32.totalorder %s178_s1, %s178_s1 }
  0x18   :  { %v41_v5 = vsel %vm40_vm0, %v38_v3, 0.0  ;;  %v44_v6 = vsel %vm40_vm0, %v39_v4, 0.0  ;;  %v53_v11 = vsub.s32 %v50_v8, %v52_v9  ;;  %v69_v18 = vsub.s32 0, %v52_v9  ;;  %p228_p8 = scmp.ne.s32.totalorder %s178_s1, %s227_s28  ;;  %p233_p10 = scmp.lt.s32.totalorder %s227_s28, %s227_s28 }
  0x19   :  { %42 = vadd.xlane.f32.xlu0 %v41_v5  ;;  %v73_v19 = vsub.s32 1, %v52_v9 }
  0x1a   :  { %p234_p11 = por %p233_p10, %p232_p9 }
  0x1c   :  { %p235_p12 = pnand %p234_p11, %p228_p8 }
  0x1d   :  { %45 = vadd.xlane.f32.xlu0 %v44_v6 }
  0xa6   :  { %v43_v10 = vpop.xlane.xlu0 %42 }
  0xa7   :  { %v54_v13 = vrot.slane %v43_v10, %v53_v11 }
  0xaa   :  { %v46_v12 = vpop.xlane.xlu0 %45 }
  0xab   :  { %v58_v14 = vrot.slane %v46_v12, %v53_v11 }
  0xad   :  { %v60_v15 = vsel %vm59_vm1, %v58_v14, %v54_v13 }
  0xae   :  { %v63_v16 = vsel %vm62_vm2, %v60_v15, -inf }
  0xaf   :  { %64 = vmax.xlane.f32.xlu1 %v63_v16 }
 0x13c   :  { %v65_v20 = vpop.xlane.xlu1 %64 }
 0x13d   :  { %v70_v21 = vrot.slane %v65_v20, %v69_v18  ;;  %v74_v22 = vrot.slane %v65_v20, %v73_v19 }
 0x13f   :  { %v77_v23 = vsub.f32 %v43_v10, %v70_v21  ;;  %v78_v24 = vsub.f32 %v46_v12, %v74_v22 }
 0x141   :  { %v79_v25 = vmul.f32 1.442695, %v77_v23  ;;  %v81_v26 = vmul.f32 1.442695, %v78_v24 }
 0x143   :  { %199 = vpow2.f32 %v79_v25 }
 0x144   :  { %201 = vpow2.f32 %v81_v26 }
 0x14d   :  { %v200_v27 = vpop.eup %199 }
 0x14e   :  { %v202_v28 = vpop.eup %201  ;;  %86 = vperm.xlu1 %197, %v200_v27  }
 0x14f   :  { %89 = vperm.xlu0 %198, %v202_v28  }
 0x1cd   :  { %v87_v29 = vpop.permute.xlu1 %86 }
 0x1ce   :  { %v90_v30 = vpop.permute.xlu0 %89  ;;  %v94_v31 = vrot.slane %v87_v29, %v53_v11 }
 0x1cf   :  { %v98_v32 = vrot.slane %v90_v30, %v53_v11 }
 0x1d1   :  { %v99_v33 = vsel %vm59_vm1, %v98_v32, %v94_v31 }
 0x1d2   :  { %v101_v34 = vsel %vm62_vm2, %v99_v33, 0.0 }
 0x1d3   :  { %102 = vadd.xlane.f32.xlu1 %v101_v34 }
 0x260   :  { %v103_v35 = vpop.xlane.xlu1 %102 }
 0x261   :  { %203 = vrcp.f32 %v103_v35 }
 0x26b   :  { %v204_v36 = vpop.eup %203 }
 0x26c   :  { %v109_v37 = vrot.slane %v204_v36, %v69_v18  ;;  %v113_v39 = vrot.slane %v204_v36, %v73_v19 }
 0x26e   :  { %v116_v38 = vmul.f32 %v200_v27, %v109_v37  ;;  %v117_v40 = vmul.f32 %v202_v28, %v113_v39 }
 0x270   :  { %120 = vperm.xlu0 %198, %v116_v38  }
 0x274   :  { %125 = vperm.xlu0 %198, %v117_v40  }
 0x2ef   :  { %v121_v41 = vpop.permute.xlu0 %120 }
 0x2f0   :  { %v128_v42 = vmul.f32 %v121_v41, %v29_v0  ;;  %v153_v46 = vrot.slane %v121_v41, %v53_v11 }
 0x2f2   :  { %v130_v43 = vsel %vm40_vm0, %v128_v42, 0.0 }
 0x2f3   :  { %v131_v44 = vrot.slane %v130_v43, 4  ;;  %v126_v45 = vpop.permute.xlu0 %125 }
 0x2f4   :  { %v129_v47 = vmul.f32 %v126_v45, %v30_v2  ;;  %v157_v48 = vrot.slane %v126_v45, %v53_v11 }
 0x2f5   :  { %v132_v49 = vadd.f32 %v131_v44, %v130_v43 }
 0x2f6   :  { %v137_v50 = vsel %vm40_vm0, %v129_v47, 0.0  ;;  %v158_v51 = vsel %vm59_vm1, %v157_v48, %v153_v46 }
 0x2f7   :  { %v133_v52 = vrot.slane %v132_v49, 2  ;;  %v138_v53 = vrot.slane %v137_v50, 4  ;;  %160 = vst.msk [vmem:[#allocation6] sm:$0x3] %vm62_vm2, %v158_v51 }
 0x2f8   :  { %238 = shalt.err (!%p235_p12)
}
 0x2f9   :  { %s239_s4 = scalar_lea.hbm %s356_s3, 32 }
 0x2fa   :  { %p240_p13 = scmp.ne.s32.totalorder %s356_s3, %s239_s4  ;;  %p243_p0 = scmp.lt.u32.totalorder %s239_s4, %s356_s3 }
 0x2fc   :  { %p245_p1 = pnand %p243_p0, %p240_p13 }
 0x2fe   :  { %248 = shalt.err (!%p245_p1)
}
 0x2ff   :  { %180 = dma.vmem_to_hbm [thread:$0]  %s178_s1, 32, %s356_s3, [#allocation7]   ;;  %v134_v54 = vadd.f32 %v133_v52, %v132_v49  ;;  %v139_v55 = vadd.f32 %v138_v53, %v137_v50  ;;  %vm148_vm3 = vcmask 254976  }
 0x300   :  { %s282_s11 = smov [#allocation5]  }
 0x301   :  { %v140_v56 = vrot.slane %v139_v55, 2  ;;  %v135_v57 = vrot.slane %v134_v54, 1  ;;  %s167_s12 = sshll.u32 %s282_s11, 4  ;;  %s168_s12 = int_to_ptr.vmem [resolvable:$true] %s167_s12 }
 0x302   :  { %s249_s13 = scalar_lea.vmem %s168_s12, 32  ;;  %p254_p3 = scmp.lt.s32.totalorder %s168_s12, %s168_s12 }
 0x303   :  { %v141_v58 = vadd.f32 %v140_v56, %v139_v55  ;;  %v136_v61 = vadd.f32 %v135_v57, %v134_v54  ;;  %p250_p2 = scmp.ne.s32.totalorder %s168_s12, %s249_s13  ;;  %p255_p4 = scmp.lt.s32.totalorder %s249_s13, %s249_s13 }
 0x305   :  { %v142_v59 = vrot.slane %v141_v58, 1  ;;  %p256_p5 = por %p255_p4, %p254_p3 }
 0x307   :  { %v143_v60 = vadd.f32 %v142_v59, %v141_v58  ;;  %p257_p6 = pnand %p256_p5, %p250_p2 }
 0x309   :  { %v146_v62 = vsel %vm59_vm1, %v143_v60, %v136_v61 }
 0x30a   :  { %149 = vst.msk [vmem:[#allocation5] sm:$0x3] %vm148_vm3, %v146_v62 }
 0x30b   :  { %260 = shalt.err (!%p257_p6)
}
 0x30c   :  { %s261_s15 = scalar_lea.hbm %s355_s2, 32 }
 0x30d   :  { %p262_p7 = scmp.ne.s32.totalorder %s355_s2, %s261_s15  ;;  %p265_p8 = scmp.lt.u32.totalorder %s261_s15, %s355_s2 }
 0x30f   :  { %p267_p9 = pnand %p265_p8, %p262_p7 }
 0x311   :  { %270 = shalt.err (!%p267_p9)
}
 0x312   :  { %170 = dma.vmem_to_hbm [thread:$0]  %s168_s12, 32, %s355_s2, [#allocation4]  }
 0x313   :  { %273 = dma.done.wait [#allocation4], 32  }
 0x314   :  { %274 = vsyncadd [#allocation4], 4294967264 }
 0x315   :  { %275 = dma.done.wait [#allocation7], 32  }
 0x316   :  { %276 = vsyncadd [#allocation7], 4294967264 }
 0x317   :  { %187 = vsyncpa [#allocation3], 1 }
 0x318   :  { %188 = vsyncpa [#allocation4], 1 }
 0x319   :  { %189 = vsyncpa [#allocation7], 1 }

</bundles_post_ra>
